<compile_context>
chip_gen: v6e
topology: v6e:2x2x1
jax: 0.10.0
libtpu: 0.0.40
codegen_flags: <defaults>
</compile_context>

<pallas_src>
import functools

import jax
import jax.numpy as jnp
from jax import lax
from jax.experimental import pallas as pl
from jax.experimental.pallas import tpu as pltpu


# ---------------------------------------------------------------------------
# Kernels
# ---------------------------------------------------------------------------
def _fwa_add_kernel(x_ref, t_ref, w_ref, b_ref, o_ref):
    # x_ref: (1, C, HWt)  t_ref: (1, 1, T)  w_ref: (C, T)  b_ref: (C, 1)
    t = t_ref[0]                                                       # (1, T)
    # Linear(noise_embed): per-channel dot product done as VPU mul + lane reduce.
    noise = jnp.sum(w_ref[...] * t, axis=-1, keepdims=True) + b_ref[...]   # (C, 1)
    o_ref[0] = (x_ref[0].astype(jnp.float32) + noise).astype(o_ref.dtype)


def _fwa_affine_kernel(x_ref, t_ref, w_ref, b_ref, o_ref, *, channels):
    # x_ref: (1, C, HWt)  t_ref: (1, 1, T)  w_ref: (2C, T)  b_ref: (2C, 1)
    t = t_ref[0]                                                       # (1, T)
    gb = jnp.sum(w_ref[...] * t, axis=-1, keepdims=True) + b_ref[...]  # (2C, 1)
    gamma = gb[:channels]                                              # (C, 1)
    beta = gb[channels:]                                               # (C, 1)
    xt = x_ref[0].astype(jnp.float32)                                  # (C, HWt)
    o_ref[0] = ((1.0 + gamma) * xt + beta).astype(o_ref.dtype)


# ---------------------------------------------------------------------------
# Wrapper
# ---------------------------------------------------------------------------
def feature_wise_affine(x, noise_embed, lin_w, lin_b, *,
                        use_affine_level=False, hw_tile=None):
    """x: (B, C, H, W); noise_embed: (B, T); lin_w: (C*(1+affine), T) torch Linear layout;
    lin_b: (C*(1+affine),). Returns (B, C, H, W)."""
    B, C, H, W = x.shape
    T = noise_embed.shape[-1]
    HW = H * W
    out_ch = lin_w.shape[0]
    assert out_ch == C * (2 if use_affine_level else 1), (out_ch, C, use_affine_level)

    x_flat = x.reshape(B, C, HW)                             # channels on sublanes, HW on lanes
    t3 = noise_embed.reshape(B, 1, T).astype(jnp.float32)
    w = lin_w.astype(jnp.float32)                            # (out_ch, T)
    b = lin_b.reshape(out_ch, 1).astype(jnp.float32)

    # Tile the spatial (lane) axis: lane-dense multiples of 128 when possible, small enough
    # to double-buffer comfortably on v5e (16 MiB scoped) and v7x (64 MiB physical) VMEM.
    if hw_tile is None:
        hw_tile = min(HW, 2048) if HW % 128 == 0 else HW
    n_hw = pl.cdiv(HW, hw_tile)

    kernel = (functools.partial(_fwa_affine_kernel, channels=C)
              if use_affine_level else _fwa_add_kernel)

    def full(shape):
        return pl.BlockSpec(shape, lambda bi, ti: (0,) * len(shape))

    act_spec = pl.BlockSpec((1, C, hw_tile), lambda bi, ti: (bi, 0, ti))

    out_flat = pl.pallas_call(
        kernel,
        out_shape=jax.ShapeDtypeStruct((B, C, HW), x.dtype),
        grid=(B, n_hw),
        in_specs=[act_spec,
                  pl.BlockSpec((1, 1, T), lambda bi, ti: (bi, 0, 0)),
                  full((out_ch, T)),
                  full((out_ch, 1))],
        out_specs=act_spec,
        compiler_params=pltpu.CompilerParams(
            dimension_semantics=("parallel", "parallel")),
    )(x_flat, t3, w, b)

    return out_flat.reshape(B, C, H, W)


# ---------------------------------------------------------------------------
# Pure-JAX reference (mirrors the PyTorch module)
# ---------------------------------------------------------------------------
def _reference(x, noise_embed, lin_w, lin_b, *, use_affine_level=False):
    B = x.shape[0]
    out = jnp.dot(noise_embed, lin_w.T, precision=lax.Precision.HIGHEST) + lin_b
    out = out.reshape(B, -1, 1, 1)
    if use_affine_level:
        gamma, beta = jnp.split(out, 2, axis=1)
        return (1.0 + gamma) * x + beta
    return x + out


if __name__ == "__main__":
    B, C, H, W, T = 2, 16, 16, 16, 32

    key = jax.random.PRNGKey(0)
    ks = jax.random.split(key, 6)
    x = jax.random.normal(ks[0], (B, C, H, W), jnp.float32)
    noise_embed = jax.random.normal(ks[1], (B, T), jnp.float32)
    lin_w = 0.2 * jax.random.normal(ks[2], (C, T), jnp.float32)         # add mode
    lin_b = 0.1 * jax.random.normal(ks[3], (C,), jnp.float32)
    lin_w2 = 0.2 * jax.random.normal(ks[4], (2 * C, T), jnp.float32)    # affine mode
    lin_b2 = 0.1 * jax.random.normal(ks[5], (2 * C,), jnp.float32)

    # use_affine_level=False (module default): x + Linear(noise_embed) broadcast
    out = jax.block_until_ready(
        feature_wise_affine(x, noise_embed, lin_w, lin_b, use_affine_level=False))
    ref = jax.block_until_ready(
        _reference(x, noise_embed, lin_w, lin_b, use_affine_level=False))
    assert out.shape == (B, C, H, W), out.shape
    err = float(jnp.max(jnp.abs(out - ref)))
    assert err < 1e-3, f"add-mode max abs err {err}"

    # use_affine_level=True: (1 + gamma) * x + beta
    out2 = jax.block_until_ready(
        feature_wise_affine(x, noise_embed, lin_w2, lin_b2, use_affine_level=True))
    ref2 = jax.block_until_ready(
        _reference(x, noise_embed, lin_w2, lin_b2, use_affine_level=True))
    err2 = float(jnp.max(jnp.abs(out2 - ref2)))
    assert err2 < 1e-3, f"affine-mode max abs err {err2}"

    print("KERNEL_OK")
</pallas_src>

<mosaic_0001>
module attributes {stable_mosaic.version = 11 : i64} {
  func.func @_fwa_add_kernel(%arg0: i32, %arg1: i32, %arg2: memref<1x16x256xf32, #tpu.memory_space<vmem>>, %arg3: memref<1x1x32xf32, #tpu.memory_space<vmem>>, %arg4: memref<16x32xf32, #tpu.memory_space<vmem>>, %arg5: memref<16x1xf32, #tpu.memory_space<vmem>>, %arg6: memref<1x16x256xf32, #tpu.memory_space<vmem>>) attributes {dimension_semantics = [#tpu.dimension_semantics<parallel>, #tpu.dimension_semantics<parallel>], iteration_bounds = array<i64: 2, 1>, scalar_prefetch = 0 : i64, scratch_operands = 0 : i64, tpu.core_type = #tpu.core_type<tc>, window_params = [{transform_indices = @transform_0, window_bounds = array<i64: 1, 16, 256>}, {transform_indices = @transform_1, window_bounds = array<i64: 1, 1, 32>}, {pipeline_mode = #tpu.pipeline_mode<synchronous>, transform_indices = @transform_2, window_bounds = array<i64: 16, 32>}, {pipeline_mode = #tpu.pipeline_mode<synchronous>, transform_indices = @transform_3, window_bounds = array<i64: 16, 1>}, {transform_indices = @transform_4, window_bounds = array<i64: 1, 16, 256>}]} {
    %c0 = arith.constant 0 : index
    %c0_0 = arith.constant 0 : index
    %c0_1 = arith.constant 0 : index
    %0 = vector.load %arg3[%c0, %c0_0, %c0_1] : memref<1x1x32xf32, #tpu.memory_space<vmem>>, vector<1x1x32xf32>
    %1 = vector.shape_cast %0 : vector<1x1x32xf32> to vector<1x32xf32>
    %c0_2 = arith.constant 0 : index
    %c0_3 = arith.constant 0 : index
    %2 = vector.load %arg4[%c0_2, %c0_3] : memref<16x32xf32, #tpu.memory_space<vmem>>, vector<16x32xf32>
    %3 = vector.broadcast %1 : vector<1x32xf32> to vector<16x32xf32>
    %4 = arith.mulf %2, %3 : vector<16x32xf32>
    %cst = arith.constant dense<0.000000e+00> : vector<16xf32>
    %5 = vector.multi_reduction <add>, %4, %cst [1] : vector<16x32xf32> to vector<16xf32>
    %6 = vector.shape_cast %5 : vector<16xf32> to vector<16x1xf32>
    %c0_4 = arith.constant 0 : index
    %c0_5 = arith.constant 0 : index
    %7 = vector.load %arg5[%c0_4, %c0_5] : memref<16x1xf32, #tpu.memory_space<vmem>>, vector<16x1xf32>
    %8 = arith.addf %6, %7 : vector<16x1xf32>
    %c0_6 = arith.constant 0 : index
    %c0_7 = arith.constant 0 : index
    %c0_8 = arith.constant 0 : index
    %9 = vector.load %arg2[%c0_6, %c0_7, %c0_8] : memref<1x16x256xf32, #tpu.memory_space<vmem>>, vector<1x16x256xf32>
    %10 = vector.shape_cast %9 : vector<1x16x256xf32> to vector<16x256xf32>
    %11 = vector.broadcast %8 : vector<16x1xf32> to vector<16x256xf32>
    %12 = arith.addf %10, %11 : vector<16x256xf32>
    %c0_9 = arith.constant 0 : index
    %c0_10 = arith.constant 0 : index
    %c0_11 = arith.constant 0 : index
    %13 = vector.load %arg6[%c0_9, %c0_10, %c0_11] : memref<1x16x256xf32, #tpu.memory_space<vmem>>, vector<1x16x256xf32>
    %14 = vector.shape_cast %13 : vector<1x16x256xf32> to vector<16x256xf32>
    %15 = vector.shape_cast %12 : vector<16x256xf32> to vector<1x16x256xf32>
    tpu.vector_store %arg6[%c0_9, %c0_10, %c0_11], %15 {strides = array<i32>} : memref<1x16x256xf32, #tpu.memory_space<vmem>>, vector<1x16x256xf32>,
    return
  }
  func.func @transform_0(%arg0: i32, %arg1: i32) -> (i32, i32, i32) {
    %c0_i32 = arith.constant 0 : i32
    %c0_i32_0 = arith.constant 0 : i32
    return %arg0, %c0_i32, %arg1 : i32, i32, i32
  }
  func.func @transform_1(%arg0: i32, %arg1: i32) -> (i32, i32, i32) {
    %c0_i32 = arith.constant 0 : i32
    %c0_i32_0 = arith.constant 0 : i32
    %c0_i32_1 = arith.constant 0 : i32
    return %arg0, %c0_i32, %c0_i32_0 : i32, i32, i32
  }
  func.func @transform_2(%arg0: i32, %arg1: i32) -> (i32, i32) {
    %c0_i32 = arith.constant 0 : i32
    %c0_i32_0 = arith.constant 0 : i32
    %c0_i32_1 = arith.constant 0 : i32
    return %c0_i32, %c0_i32_0 : i32, i32
  }
  func.func @transform_3(%arg0: i32, %arg1: i32) -> (i32, i32) {
    %c0_i32 = arith.constant 0 : i32
    %c0_i32_0 = arith.constant 0 : i32
    %c0_i32_1 = arith.constant 0 : i32
    return %c0_i32, %c0_i32_0 : i32, i32
  }
  func.func @transform_4(%arg0: i32, %arg1: i32) -> (i32, i32, i32) {
    %c0_i32 = arith.constant 0 : i32
    %c0_i32_0 = arith.constant 0 : i32
    return %arg0, %c0_i32, %arg1 : i32, i32, i32
  }
}

</mosaic_0001>

<bundles_post_ra>
// kernel: tpu_custom_call.1
= control target key start
LH: loop header
LB: loop body
LE: loop exit
PB: predicated region body
PF: predicated region fallthrough
CT: control target
= control target key end

     0   :  { %9 = vsyncpa [#allocation3], 0  ;;  %s808_s0 = inlined_call_operand.hbm [shape: f32[2,16,256], index: 0, kind: input, shape index: {}]   ;;  %s809_s1 = inlined_call_operand.vmem [shape: f32[2,1,32], index: 1, kind: input, shape index: {}]   ;;  %s810_s2 = inlined_call_operand.vmem [shape: f32[16,32], index: 2, kind: input, shape index: {}]   ;;  %s811_s3 = inlined_call_operand.vmem [shape: f32[16,1], index: 3, kind: input, shape index: {}]   ;;  %s812_s4 = inlined_call_operand.hbm [shape: f32[2,16,256], index: 4, kind: output, shape index: {}]  }
   0x1   :  { %11 = vsyncpa [#allocation3 + $0x1], 0 }
   0x2   :  { %12 = vsyncpa [#allocation4], 0 }
   0x3   :  { %14 = vsyncpa [#allocation4 + $0x1], 0  ;;  %s635_s15 = smov 0   ;;  %s637_s16 = smov 0  }
   0x4   :  { %s639_s17 = smov 0   ;;  %s641_s18 = smov 0  }
   0x5   :  { %s643_s19 = smov 0   ;;  %s645_s20 = smov 0  }
   0x6 LB: > { %s406_s21 = sadd.s32 4294967295, %s601_s20   ;;  %s407_s22 = sadd.s32 4294967294, %s601_s20   ;;  %s601_s20 = sphi %s645_s20, %s20_s20   ;;  %s597_s19 = sphi %s643_s19, %s823_s19   ;;  %s593_s18 = sphi %s641_s18, %s822_s18   ;;  %s589_s17 = sphi %s639_s17, %s821_s17   ;;  %s585_s16 = sphi %s637_s16, %s820_s16   ;;  %s581_s15 = sphi %s635_s15, %s819_s15  }
   0x7   : > { %s32_s23 = sadd.s32 1, %s597_s19  ;;  %s41_s24 = sadd.s32 1, %s589_s17 }
   0x8   : > { %p34_p0 = scmp.ge.s32.totalorder %s32_s23, 2  ;;  %p48_p1 = scmp.ne.s32.totalorder %s589_s17, %s585_s16 }
   0x9   : > { %p49_p2 = scmp.eq.s32.totalorder %s601_s20, 0  ;;  %p54_p3 = scmp.ne.s32.totalorder %s585_s16, %s581_s15 }
   0xa   : > { %s825_s23 = smov (%p34_p0, %s32_s23), 0  ;;  %p55_p5 = scmp.eq.s32.totalorder %s406_s21, 0 }
   0xb   : > { %p676_p4 = por %p49_p2, %p48_p1  ;;  %s36_s26 = ssub.s32 %s597_s19, %s825_s23 }
   0xc   : > { %p148_p6 = scmp.eq.s32.totalorder %s406_s21, 1  ;;  %p39_p7 = scmp.eq.s32.totalorder %s36_s26, 0 }
   0xd   : > { %p682_p8 = por %p55_p5, %p54_p3  ;;  %p154_p10 = scmp.eq.s32.totalorder %s407_s22, 1 }
   0xe   : > { %p686_p9 = por %p148_p6, %p48_p1  ;;  %p436_p13 = scmp.lt.s32.totalorder %s601_s20, 2 }
   0xf   : > { %s691_s29 = scalar_select %p39_p7, %s589_s17, %s41_s24  }
  0x10   : > { %p693_p11 = por %p154_p10, %p54_p3  ;;  %s180_s5 = sand.u32 1, %s589_s17  }
  0x11   : > { %s410_s6 = sshll.u32 %s180_s5, 5  ;;  %s422_s7 = sshll.u32 %s597_s19, 9 }
  0x12   : > { %s192_s10 = scalar_lea.hbm %s808_s0, %s422_s7  ;;  %s184_s11 = scalar_lea.vmem [#allocation2], %s410_s6 }
  0x13   : > { %s193_s12 = sshll.u32 %s184_s11, 4  ;;  %p706_p0 = pnand %p436_p13, %p676_p4  ;;  %s194_s12 = int_to_ptr.vmem [resolvable:$true] %s193_s12 }
  0x14   : > { %p413_p1 = scmp.ge.s32.totalorder %s601_s20, 1  ;;  %s181_s14 = scalar_lea.sflag [#allocation3], %s180_s5 }
  0x15   : > { %p495_p2 = pneg %p706_p0  ;;  %s506_s21 = scalar_lea.vmem %s194_s12, 512 }
  0x16   : > { %p507_p3 = scmp.ne.s32.totalorder %s194_s12, %s506_s21  ;;  %s603_s22 = smov [#allocation2]  }
  0x17   : > { %s511_s24 = sshll.u32 %s603_s22, 4  ;;  %s512_s24 = int_to_ptr.vmem [resolvable:$false] %s511_s24 }
  0x18   : > { %p509_p5 = pnand %p507_p3, %p495_p2  ;;  %s513_s26 = scalar_lea.vmem %s512_s24, 1024 }
  0x19   : > { %p514_p7 = scmp.lt.s32.totalorder %s194_s12, %s512_s24  ;;  %p515_p10 = scmp.lt.s32.totalorder %s513_s26, %s506_s21 }
  0x1a   : > { %p510_p6 = pneg %p509_p5 }
  0x1b   : > { %p516_p12 = por %p515_p10, %p514_p7 }
  0x1d   : > { %p517_p4 = pnand %p516_p12, %p510_p6 }
  0x1f   : > { %520 = shalt.err (!%p517_p4)
}
  0x20   : > { %s604_s25 = smov 256   ;;  %s605_s5 = smov 16  }
  0x21   : > { %431 = dma.hbm_to_vmem [thread:$0]  (!%p706_p0), %s192_s10, 512, %s194_s12, %s181_s14, %s604_s25, %s604_s25, %s605_s5  }
  0x22   : > { %p207_p13 = scmp.lt.s32.totalorder %s601_s20, 3 }
  0x24   : > { %p208_p2 = pnand %p413_p1, %p207_p13 }
  0x25   : > { %s719_s6 = sand.u32 (!%p208_p2), 1, %s585_s16  }
  0x26   : > { %211 = sbr.rel (%p208_p2) target bundleno = 337 (0x151), region = 36  ;;  %s414_s7 = sshll.u32 (!%p208_p2), %s719_s6, 5 }
  0x27   : > { %s214_s8 = scalar_lea.sflag (!%p208_p2), [#allocation3], %s719_s6  ;;  %s725_s9 = scalar_lea.vmem (!%p208_p2), [#allocation2], %s414_s7 }
  0x2b   : > { %572 = dma.done.wait (%p682_p8), %s214_s8, 512  }
  0x2c   : > { %574 = vsyncadd (%p682_p8), %s214_s8, 4294966784  ;;  %p246_p12 = scmp.lt.s32.totalorder %s593_s18, 1  ;;  %v251_v1 = vld [vmem:[%s810_s2] sm:$0xff]  ;;  %vm261_vm0 = vcmask 261120   ;;  %v252_v2 = vld [vmem:[%s810_s2 + $0x8] sm:$0xff]  ;;  %v606_v7 = vmov 0  }
  0x2d   : > { %491 = vset.pattern.permute.xlu1 %v606_v7  ;;  %492 = vset.pattern.permute.xlu0 %v606_v7  ;;  %v268_v8 = vld [vmem:[%s811_s3] sm:$0xff]  ;;  %v269_v11 = vld [vmem:[%s811_s3 + $0x8] sm:$0xff]  ;;  %s244_s8 = scalar_lea.vmem [#allocation5], %s414_s7  ;;  %s423_s11 = sshll.u32 %s593_s18, 9  ;;  %v274_v19 = vld [vmem:[%s725_s9 + $0x10] sm:$0xff] }
  0x2e   : > { %s247_s10 = scalar_select %p246_p12, %s593_s18, 1  ;;  %v272_v14 = vld [vmem:[%s725_s9] sm:$0xff]  ;;  %v273_v15 = vld [vmem:[%s725_s9 + $0x8] sm:$0xff]  ;;  %v275_v20 = vld [vmem:[%s725_s9 + $0x18] sm:$0xff] }
  0x2f   : > { %s760_s7 = scalar_lea.hbm %s812_s4, %s423_s11  ;;  %s295_s18 = scalar_lea.sflag [#allocation4], %s719_s6 }
  0x30   : > { %s248_s13 = scalar_lea.vmem %s809_s1, %s247_s10  ;;  %s310_s10 = sshll.u32 %s244_s8, 4  ;;  %s755_s10 = int_to_ptr.vmem [resolvable:$true] %s310_s10 }
  0x31   : > { %v416_v0 = vld [vmem:[%s248_s13] ss:$0 sm:$0xff]  ;;  %s521_s14 = scalar_lea.vmem %s755_s10, 512  ;;  %s607_s9 = smov [#allocation5]  }
  0x32   : > { %v259_v3 = vmul.f32 %v416_v0, %v251_v1  ;;  %v260_v4 = vmul.f32 %v416_v0, %v252_v2  ;;  %p522_p8 = scmp.ne.s32.totalorder %s755_s10, %s521_s14  ;;  %s525_s21 = sshll.u32 %s607_s9, 4  ;;  %s526_s21 = int_to_ptr.vmem [resolvable:$false] %s525_s21 }
  0x33   : > { %s527_s22 = scalar_lea.vmem %s526_s21, 1024  ;;  %p528_p3 = scmp.lt.s32.totalorder %s755_s10, %s526_s21 }
  0x34   : > { %v262_v5 = vsel %vm261_vm0, %v259_v3, 0.0  ;;  %v265_v6 = vsel %vm261_vm0, %v260_v4, 0.0  ;;  %p523_p0 = pnand %p522_p8, %p686_p9  ;;  %p529_p5 = scmp.lt.s32.totalorder %s527_s22, %s521_s14 }
  0x35   : > { %263 = vadd.xlane.f32.xlu0 %v262_v5 }
  0x36   : > { %p524_p1 = pneg %p523_p0  ;;  %p530_p6 = por %p529_p5, %p528_p3 }
  0x38   : > { %p531_p7 = pnand %p530_p6, %p524_p1 }
  0x39   : > { %266 = vadd.xlane.f32.xlu0 %v265_v6 }
  0xbe   : > { %v264_v9 = vpop.xlane.xlu0 %263 }
  0xbf   : > { %v270_v10 = vadd.f32 %v268_v8, %v264_v9 }
  0xc1   : > { %278 = vperm.xlu1 %491, %v270_v10  }
  0xc2   : > { %v267_v12 = vpop.xlane.xlu0 %266 }
  0xc3   : > { %v271_v13 = vadd.f32 %v269_v11, %v267_v12 }
  0xc5   : > { %283 = vperm.xlu1 %491, %v271_v13  }
 0x13c   : > { %v279_v16 = vpop.permute.xlu1 %278 }
 0x13d   : > { %v286_v17 = vadd.f32 %v279_v16, %v272_v14  ;;  %v287_v18 = vadd.f32 %v279_v16, %v273_v15 }
 0x13f   : > { %290 = vst [vmem:[%s244_s8] sm:$0xff] %v286_v17  ;;  %291 = vst [vmem:[%s244_s8 + $0x8] sm:$0xff] %v287_v18 }
 0x140   : > { %v284_v21 = vpop.permute.xlu1 %283 }
 0x141   : > { %v288_v22 = vadd.f32 %v284_v21, %v274_v19  ;;  %v289_v23 = vadd.f32 %v284_v21, %v275_v20 }
 0x143   : > { %292 = vst [vmem:[%s244_s8 + $0x10] sm:$0xff] %v288_v22  ;;  %293 = vst [vmem:[%s244_s8 + $0x18] sm:$0xff] %v289_v23 }
 0x144   : > { %534 = shalt.err (!%p531_p7)
}
 0x145   : > { %s535_s24 = scalar_lea.hbm %s760_s7, 512  ;;  %s539_s25 = scalar_lea.hbm %s812_s4, 1024 }
 0x146   : > { %p536_p10 = scmp.ne.s32.totalorder %s760_s7, %s535_s24  ;;  %p540_p2 = scmp.lt.s32.totalorder %s760_s7, %s812_s4 }
 0x147   : > { %p541_p12 = scmp.lt.s32.totalorder %s539_s25, %s535_s24 }
 0x148   : > { %p537_p4 = pnand %p536_p10, %p686_p9 }
 0x149   : > { %p542_p8 = por %p541_p12, %p540_p2 }
 0x14a   : > { %p538_p13 = pneg %p537_p4 }
 0x14c   : > { %p543_p0 = pnand %p542_p8, %p538_p13 }
 0x14e   : > { %546 = shalt.err (!%p543_p0)
}
 0x14f   : > { %s608_s11 = smov 256   ;;  %s609_s12 = smov 16  }
 0x150   : > { %426 = dma.vmem_to_hbm [thread:$0]  (%p686_p9), %s755_s10, 512, %s760_s7, %s295_s18, %s608_s11, %s608_s11, %s609_s12  }
 0x151 PF: > { %s325_s13 = sand.u32 1, %s581_s15   ;;  %p818_p1 = scmp.ge.s32.totalorder %s601_s20, 2 }
 0x152   : > { %s326_s14 = scalar_lea.sflag [#allocation4], %s325_s13 }
 0x153   : > { %p433_p3 = pnand %p818_p1, %p693_p11 }
 0x155   : > { %p434_p5 = pneg %p433_p3 }
 0x157   : > { %576 = dma.done.wait (%p434_p5), %s326_s14, 512  }
 0x158   : > { %578 = vsyncadd (%p434_p5), %s326_s14, 4294966784  ;;  %s20_s20 = sadd.s32 1, %s601_s20   ;;  %s819_s15 = smov %s585_s16 }
 0x159   : > { %p17_p6 = scmp.ge.s32.totalorder %s20_s20, 4   ;;  %s820_s16 = smov %s589_s17 }
 0x15a   : > { %s821_s17 = smov %s691_s29  ;;  %s822_s18 = smov %s597_s19 }
 0x15b   : > { %s823_s19 = smov %s825_s23  ;;  %19 = sbr.rel (!%p17_p6) target bundleno = 6 (0x6), region = 84 }
 0x160   :  { %331 = vsyncpa [#allocation3], 1 }
 0x161   :  { %333 = vsyncpa [#allocation3 + $0x1], 1 }
 0x162   :  { %334 = vsyncpa [#allocation4], 1 }
 0x163   :  { %336 = vsyncpa [#allocation4 + $0x1], 1 }

</bundles_post_ra>
